<compile_context>
chip_gen: v6e
topology: v6e:2x2x1
jax: 0.10.0
libtpu: 0.0.40
codegen_flags: <defaults>
</compile_context>

<pallas_src>
import jax
import jax.numpy as jnp
from jax.experimental import pallas as pl
from jax.experimental.pallas import tpu as pltpu


def _pick_lane_width(total):
    """Last-dim width of the flattened 2-D view handed to the DMA kernel.
    Prefer large multiples of 128 so each chunk DMA is a wide contiguous stride;
    any divisor is correct (DMA has no (8,128) vector-layout requirement)."""
    for lane in (4096, 2048, 1024, 512, 256, 128, 64, 32, 16, 8, 4, 2, 1):
        if total % lane == 0:
            return lane
    return 1


def _plan_chunks(rows, target_chunks=8):
    """Split `rows` into <= target_chunks contiguous static chunks (4-8 DMAs in
    flight saturates the DMA engines; all offsets/sizes are trace-time Python)."""
    n = max(1, min(target_chunks, rows))
    base, rem = divmod(rows, n)
    offsets, sizes, off = [], [], 0
    for i in range(n):
        s = base + (1 if i < rem else 0)
        offsets.append(off)
        sizes.append(s)
        off += s
    return offsets, sizes


def _make_dma_copy_kernel(offsets, sizes):
    """HBM->HBM copy: issue all chunk DMAs, then wait on all of them."""
    n = len(offsets)

    def kernel(x_hbm, o_hbm, sems):
        copies = []
        for i in range(n):
            cp = pltpu.make_async_copy(
                x_hbm.at[pl.ds(offsets[i], sizes[i])],
                o_hbm.at[pl.ds(offsets[i], sizes[i])],
                sems.at[i],
            )
            cp.start()
            copies.append(cp)
        for cp in copies:
            cp.wait()

    return kernel


def _pallas_hbm_copy(x2):
    """Pure DMA HBM->HBM copy of a 2-D (rows, lanes) array."""
    rows, lanes = x2.shape
    itemsize = jnp.dtype(x2.dtype).itemsize
    offsets, sizes = _plan_chunks(rows, target_chunks=8)
    kernel = _make_dma_copy_kernel(offsets, sizes)
    return pl.pallas_call(
        kernel,
        out_shape=jax.ShapeDtypeStruct((rows, lanes), x2.dtype),
        in_specs=[pl.BlockSpec(memory_space=pl.ANY)],
        out_specs=pl.BlockSpec(memory_space=pl.ANY),
        scratch_shapes=[pltpu.SemaphoreType.DMA((len(offsets),))],
        cost_estimate=pl.CostEstimate(
            flops=0,
            transcendentals=0,
            bytes_accessed=2 * rows * lanes * itemsize,
        ),
    )(x2)


def height_compression_spatial_features(x, *, use_pallas_copy=False):
    """x: dense [N, C, D, H, W] -> [N, C*D, H, W] BEV pseudo-image.

    Default: metadata-only reshape (the view is contiguous; fastest possible).
    use_pallas_copy=True: route through the HBM->HBM DMA Pallas kernel.
    """
    N, C, D, H, W = x.shape
    CD = C * D
    if not use_pallas_copy:
        # out[n, c*D + d, h, w] == x[n, c, d, h, w]: exactly the contiguous view.
        return jnp.reshape(x, (N, CD, H, W))

    total = N * CD * H * W
    lanes = _pick_lane_width(total)
    x2 = jnp.reshape(x, (total // lanes, lanes))  # free (contiguous) reshape
    out2 = _pallas_hbm_copy(x2)
    return jnp.reshape(out2, (N, CD, H, W))       # free reshape to NCHW


def height_compression_forward(batch_dict, *, use_pallas_copy=False):
    """Mirrors HeightCompression.forward for a batch_dict with a dense tensor."""
    x = batch_dict["encoded_spconv_tensor"]  # dense [N, C, D, H, W]
    out = dict(batch_dict)
    out["spatial_features"] = height_compression_spatial_features(
        x, use_pallas_copy=use_pallas_copy
    )
    out["spatial_features_stride"] = batch_dict["encoded_spconv_tensor_stride"]
    return out


if __name__ == "__main__":
    # Small shapes consistent with the module: NUM_BEV_FEATURES = C * D = 32.
    N, C, D, H, W = 2, 4, 8, 16, 16
    key = jax.random.PRNGKey(0)
    x = jax.random.normal(key, (N, C, D, H, W), dtype=jnp.float32)

    batch_dict = {
        "encoded_spconv_tensor": x,
        "encoded_spconv_tensor_stride": 8,
    }

    # Reference: torch's .view(N, C*D, H, W) == contiguous reshape.
    ref = jnp.reshape(x, (N, C * D, H, W))

    # Default fast path (metadata-only reshape).
    out_fast = height_compression_forward(batch_dict)
    sf_fast = jax.block_until_ready(out_fast["spatial_features"])

    # Pallas DMA-copy path (the kernel under test).
    out_k = height_compression_forward(batch_dict, use_pallas_copy=True)
    sf_k = jax.block_until_ready(out_k["spatial_features"])

    assert sf_fast.shape == (N, C * D, H, W)
    assert sf_k.shape == (N, C * D, H, W)
    assert sf_k.dtype == x.dtype
    assert out_k["spatial_features_stride"] == 8
    assert jnp.array_equal(sf_fast, ref)
    assert jnp.array_equal(sf_k, ref)

    print("KERNEL_OK")
</pallas_src>

<mosaic_0001>
module attributes {stable_mosaic.version = 11 : i64} {
  func.func @kernel(%arg0: memref<4x4096xf32, #tpu.memory_space<any>>, %arg1: memref<4x4096xf32, #tpu.memory_space<any>>, %arg2: memref<4x!tpu.dma_semaphore, #tpu.memory_space<semaphore_mem>>) attributes {dimension_semantics = [], scalar_prefetch = 0 : i64, scratch_operands = 1 : i64, tpu.core_type = #tpu.core_type<tc>} {
    %c0_i32 = arith.constant 0 : i32
    %c0_i32_0 = arith.constant 0 : i32
    %c0_i32_1 = arith.constant 0 : i32
    %0 = tpu.memref_slice %arg0[%c0_i32_0, %c0_i32_1] : memref<4x4096xf32, #tpu.memory_space<any>> -> memref<1x4096xf32, #tpu.memory_space<any>>
    %c0_i32_2 = arith.constant 0 : i32
    %c0_i32_3 = arith.constant 0 : i32
    %1 = tpu.memref_slice %arg1[%c0_i32_2, %c0_i32_3] : memref<4x4096xf32, #tpu.memory_space<any>> -> memref<1x4096xf32, #tpu.memory_space<any>>
    %2 = tpu.memref_slice %arg2[%c0_i32] : memref<4x!tpu.dma_semaphore, #tpu.memory_space<semaphore_mem>> -> memref<1x!tpu.dma_semaphore, #tpu.memory_space<semaphore_mem>>
    %3 = tpu.memref_squeeze %2 : memref<1x!tpu.dma_semaphore, #tpu.memory_space<semaphore_mem>> -> memref<!tpu.dma_semaphore, #tpu.memory_space<semaphore_mem>>
    tpu.enqueue_dma source(%0 : memref<1x4096xf32, #tpu.memory_space<any>>) target(%1 : memref<1x4096xf32, #tpu.memory_space<any>>) target_semaphore(%3 : memref<!tpu.dma_semaphore, #tpu.memory_space<semaphore_mem>>)
    %c1_i32 = arith.constant 1 : i32
    %c1_i32_4 = arith.constant 1 : i32
    %c0_i32_5 = arith.constant 0 : i32
    %4 = tpu.memref_slice %arg0[%c1_i32_4, %c0_i32_5] : memref<4x4096xf32, #tpu.memory_space<any>> -> memref<1x4096xf32, #tpu.memory_space<any>>
    %c1_i32_6 = arith.constant 1 : i32
    %c0_i32_7 = arith.constant 0 : i32
    %5 = tpu.memref_slice %arg1[%c1_i32_6, %c0_i32_7] : memref<4x4096xf32, #tpu.memory_space<any>> -> memref<1x4096xf32, #tpu.memory_space<any>>
    %6 = tpu.memref_slice %arg2[%c1_i32] : memref<4x!tpu.dma_semaphore, #tpu.memory_space<semaphore_mem>> -> memref<1x!tpu.dma_semaphore, #tpu.memory_space<semaphore_mem>>
    %7 = tpu.memref_squeeze %6 : memref<1x!tpu.dma_semaphore, #tpu.memory_space<semaphore_mem>> -> memref<!tpu.dma_semaphore, #tpu.memory_space<semaphore_mem>>
    tpu.enqueue_dma source(%4 : memref<1x4096xf32, #tpu.memory_space<any>>) target(%5 : memref<1x4096xf32, #tpu.memory_space<any>>) target_semaphore(%7 : memref<!tpu.dma_semaphore, #tpu.memory_space<semaphore_mem>>)
    %c2_i32 = arith.constant 2 : i32
    %c2_i32_8 = arith.constant 2 : i32
    %c0_i32_9 = arith.constant 0 : i32
    %8 = tpu.memref_slice %arg0[%c2_i32_8, %c0_i32_9] : memref<4x4096xf32, #tpu.memory_space<any>> -> memref<1x4096xf32, #tpu.memory_space<any>>
    %c2_i32_10 = arith.constant 2 : i32
    %c0_i32_11 = arith.constant 0 : i32
    %9 = tpu.memref_slice %arg1[%c2_i32_10, %c0_i32_11] : memref<4x4096xf32, #tpu.memory_space<any>> -> memref<1x4096xf32, #tpu.memory_space<any>>
    %10 = tpu.memref_slice %arg2[%c2_i32] : memref<4x!tpu.dma_semaphore, #tpu.memory_space<semaphore_mem>> -> memref<1x!tpu.dma_semaphore, #tpu.memory_space<semaphore_mem>>
    %11 = tpu.memref_squeeze %10 : memref<1x!tpu.dma_semaphore, #tpu.memory_space<semaphore_mem>> -> memref<!tpu.dma_semaphore, #tpu.memory_space<semaphore_mem>>
    tpu.enqueue_dma source(%8 : memref<1x4096xf32, #tpu.memory_space<any>>) target(%9 : memref<1x4096xf32, #tpu.memory_space<any>>) target_semaphore(%11 : memref<!tpu.dma_semaphore, #tpu.memory_space<semaphore_mem>>)
    %c3_i32 = arith.constant 3 : i32
    %c3_i32_12 = arith.constant 3 : i32
    %c0_i32_13 = arith.constant 0 : i32
    %12 = tpu.memref_slice %arg0[%c3_i32_12, %c0_i32_13] : memref<4x4096xf32, #tpu.memory_space<any>> -> memref<1x4096xf32, #tpu.memory_space<any>>
    %c3_i32_14 = arith.constant 3 : i32
    %c0_i32_15 = arith.constant 0 : i32
    %13 = tpu.memref_slice %arg1[%c3_i32_14, %c0_i32_15] : memref<4x4096xf32, #tpu.memory_space<any>> -> memref<1x4096xf32, #tpu.memory_space<any>>
    %14 = tpu.memref_slice %arg2[%c3_i32] : memref<4x!tpu.dma_semaphore, #tpu.memory_space<semaphore_mem>> -> memref<1x!tpu.dma_semaphore, #tpu.memory_space<semaphore_mem>>
    %15 = tpu.memref_squeeze %14 : memref<1x!tpu.dma_semaphore, #tpu.memory_space<semaphore_mem>> -> memref<!tpu.dma_semaphore, #tpu.memory_space<semaphore_mem>>
    tpu.enqueue_dma source(%12 : memref<1x4096xf32, #tpu.memory_space<any>>) target(%13 : memref<1x4096xf32, #tpu.memory_space<any>>) target_semaphore(%15 : memref<!tpu.dma_semaphore, #tpu.memory_space<semaphore_mem>>)
    %c0_i32_16 = arith.constant 0 : i32
    %c0_i32_17 = arith.constant 0 : i32
    %c0_i32_18 = arith.constant 0 : i32
    %16 = tpu.memref_slice %arg0[%c0_i32_17, %c0_i32_18] : memref<4x4096xf32, #tpu.memory_space<any>> -> memref<1x4096xf32, #tpu.memory_space<any>>
    %c0_i32_19 = arith.constant 0 : i32
    %c0_i32_20 = arith.constant 0 : i32
    %17 = tpu.memref_slice %arg1[%c0_i32_19, %c0_i32_20] : memref<4x4096xf32, #tpu.memory_space<any>> -> memref<1x4096xf32, #tpu.memory_space<any>>
    %18 = tpu.memref_slice %arg2[%c0_i32_16] : memref<4x!tpu.dma_semaphore, #tpu.memory_space<semaphore_mem>> -> memref<1x!tpu.dma_semaphore, #tpu.memory_space<semaphore_mem>>
    %19 = tpu.memref_squeeze %18 : memref<1x!tpu.dma_semaphore, #tpu.memory_space<semaphore_mem>> -> memref<!tpu.dma_semaphore, #tpu.memory_space<semaphore_mem>>
    tpu.wait_dma2 semaphore(%19 : memref<!tpu.dma_semaphore, #tpu.memory_space<semaphore_mem>>) src(%16 : memref<1x4096xf32, #tpu.memory_space<any>>) dst(%17 : memref<1x4096xf32, #tpu.memory_space<any>>)
    %c1_i32_21 = arith.constant 1 : i32
    %c1_i32_22 = arith.constant 1 : i32
    %c0_i32_23 = arith.constant 0 : i32
    %20 = tpu.memref_slice %arg0[%c1_i32_22, %c0_i32_23] : memref<4x4096xf32, #tpu.memory_space<any>> -> memref<1x4096xf32, #tpu.memory_space<any>>
    %c1_i32_24 = arith.constant 1 : i32
    %c0_i32_25 = arith.constant 0 : i32
    %21 = tpu.memref_slice %arg1[%c1_i32_24, %c0_i32_25] : memref<4x4096xf32, #tpu.memory_space<any>> -> memref<1x4096xf32, #tpu.memory_space<any>>
    %22 = tpu.memref_slice %arg2[%c1_i32_21] : memref<4x!tpu.dma_semaphore, #tpu.memory_space<semaphore_mem>> -> memref<1x!tpu.dma_semaphore, #tpu.memory_space<semaphore_mem>>
    %23 = tpu.memref_squeeze %22 : memref<1x!tpu.dma_semaphore, #tpu.memory_space<semaphore_mem>> -> memref<!tpu.dma_semaphore, #tpu.memory_space<semaphore_mem>>
    tpu.wait_dma2 semaphore(%23 : memref<!tpu.dma_semaphore, #tpu.memory_space<semaphore_mem>>) src(%20 : memref<1x4096xf32, #tpu.memory_space<any>>) dst(%21 : memref<1x4096xf32, #tpu.memory_space<any>>)
    %c2_i32_26 = arith.constant 2 : i32
    %c2_i32_27 = arith.constant 2 : i32
    %c0_i32_28 = arith.constant 0 : i32
    %24 = tpu.memref_slice %arg0[%c2_i32_27, %c0_i32_28] : memref<4x4096xf32, #tpu.memory_space<any>> -> memref<1x4096xf32, #tpu.memory_space<any>>
    %c2_i32_29 = arith.constant 2 : i32
    %c0_i32_30 = arith.constant 0 : i32
    %25 = tpu.memref_slice %arg1[%c2_i32_29, %c0_i32_30] : memref<4x4096xf32, #tpu.memory_space<any>> -> memref<1x4096xf32, #tpu.memory_space<any>>
    %26 = tpu.memref_slice %arg2[%c2_i32_26] : memref<4x!tpu.dma_semaphore, #tpu.memory_space<semaphore_mem>> -> memref<1x!tpu.dma_semaphore, #tpu.memory_space<semaphore_mem>>
    %27 = tpu.memref_squeeze %26 : memref<1x!tpu.dma_semaphore, #tpu.memory_space<semaphore_mem>> -> memref<!tpu.dma_semaphore, #tpu.memory_space<semaphore_mem>>
    tpu.wait_dma2 semaphore(%27 : memref<!tpu.dma_semaphore, #tpu.memory_space<semaphore_mem>>) src(%24 : memref<1x4096xf32, #tpu.memory_space<any>>) dst(%25 : memref<1x4096xf32, #tpu.memory_space<any>>)
    %c3_i32_31 = arith.constant 3 : i32
    %c3_i32_32 = arith.constant 3 : i32
    %c0_i32_33 = arith.constant 0 : i32
    %28 = tpu.memref_slice %arg0[%c3_i32_32, %c0_i32_33] : memref<4x4096xf32, #tpu.memory_space<any>> -> memref<1x4096xf32, #tpu.memory_space<any>>
    %c3_i32_34 = arith.constant 3 : i32
    %c0_i32_35 = arith.constant 0 : i32
    %29 = tpu.memref_slice %arg1[%c3_i32_34, %c0_i32_35] : memref<4x4096xf32, #tpu.memory_space<any>> -> memref<1x4096xf32, #tpu.memory_space<any>>
    %30 = tpu.memref_slice %arg2[%c3_i32_31] : memref<4x!tpu.dma_semaphore, #tpu.memory_space<semaphore_mem>> -> memref<1x!tpu.dma_semaphore, #tpu.memory_space<semaphore_mem>>
    %31 = tpu.memref_squeeze %30 : memref<1x!tpu.dma_semaphore, #tpu.memory_space<semaphore_mem>> -> memref<!tpu.dma_semaphore, #tpu.memory_space<semaphore_mem>>
    tpu.wait_dma2 semaphore(%31 : memref<!tpu.dma_semaphore, #tpu.memory_space<semaphore_mem>>) src(%28 : memref<1x4096xf32, #tpu.memory_space<any>>) dst(%29 : memref<1x4096xf32, #tpu.memory_space<any>>)
    return
  }
}

</mosaic_0001>

<bundles_post_ra>
// kernel: tpu_custom_call.1
= control target key start
LH: loop header
LB: loop body
LE: loop exit
PB: predicated region body
PF: predicated region fallthrough
CT: control target
= control target key end

     0   :  { %s123_s6 = smov 64   ;;  %s124_s7 = smov 1   ;;  %s165_s0 = inlined_call_operand.hbm [shape: f32[4,4096], index: 0, kind: input, shape index: {}]   ;;  %s166_s1 = inlined_call_operand.hbm [shape: f32[4,4096], index: 1, kind: output, shape index: {}]  }
   0x1   :  { %12 = sst [smem:[#allocation4]] %s123_s6  ;;  %s125_s8 = smov [#allocation2]  }
   0x2   :  { %14 = sst [smem:[#allocation4 + $0x1]] %s123_s6  ;;  %s126_s9 = smov 131072  }
   0x3   :  { %16 = sst [smem:[#allocation4 + $0x2]] %s124_s7  ;;  %s127_s10 = smov 0  }
   0x4   :  { %18 = dma.general %s165_s0, 512, %s166_s1, %s125_s8, %s126_s9, [#allocation4], %s127_s10, 0  }
   0x5   :  { %28 = sst [smem:[#allocation6]] %s123_s6  ;;  %s19_s17 = scalar_lea.hbm %s165_s0, 16 }
   0x6   :  { %30 = sst [smem:[#allocation6 + $0x1]] %s123_s6  ;;  %s20_s20 = scalar_lea.hbm %s166_s1, 16 }
   0x7   :  { %32 = sst [smem:[#allocation6 + $0x2]] %s124_s7  ;;  %s128_s21 = smov [#allocation2 + $0x1]  }
   0x8   :  { %34 = dma.general %s19_s17, 512, %s20_s20, %s128_s21, %s126_s9, [#allocation6], %s127_s10, 0  }
   0x9   :  { %44 = sst [smem:[#allocation8]] %s123_s6  ;;  %s35_s24 = scalar_lea.hbm %s165_s0, 32 }
   0xa   :  { %46 = sst [smem:[#allocation8 + $0x1]] %s123_s6  ;;  %s36_s27 = scalar_lea.hbm %s166_s1, 32 }
   0xb   :  { %48 = sst [smem:[#allocation8 + $0x2]] %s124_s7  ;;  %s129_s28 = smov [#allocation2 + $0x2]  }
   0xc   :  { %50 = dma.general %s35_s24, 512, %s36_s27, %s129_s28, %s126_s9, [#allocation8], %s127_s10, 0  }
   0xd   :  { %60 = sst [smem:[#allocation10]] %s123_s6  ;;  %s51_s2 = scalar_lea.hbm %s165_s0, 48 }
   0xe   :  { %62 = sst [smem:[#allocation10 + $0x1]] %s123_s6  ;;  %s52_s5 = scalar_lea.hbm %s166_s1, 48 }
   0xf   :  { %64 = sst [smem:[#allocation10 + $0x2]] %s124_s7  ;;  %s130_s8 = smov [#allocation2 + $0x3]  }
  0x10   :  { %66 = dma.general %s51_s2, 512, %s52_s5, %s130_s8, %s126_s9, [#allocation10], %s127_s10, 0  }
  0x11   :  { %115 = dma.done.wait [#allocation2], 512 }
  0x12   :  { %116 = vsyncadd [#allocation2], 4294966784 }
  0x13   :  { %117 = dma.done.wait [#allocation2 + $0x1], 512 }
  0x14   :  { %118 = vsyncadd [#allocation2 + $0x1], 4294966784 }
  0x15   :  { %119 = dma.done.wait [#allocation2 + $0x2], 512 }
  0x16   :  { %120 = vsyncadd [#allocation2 + $0x2], 4294966784 }
  0x17   :  { %121 = dma.done.wait [#allocation2 + $0x3], 512 }
  0x18   :  { %122 = vsyncadd [#allocation2 + $0x3], 4294966784 }
  0x19   :  { %76 = vsyncmov [#allocation2] }
  0x1c   :  { %s77_s11 = vpop.sfrf %76 }
  0x1d   :  { %p103_p0 = scmp.ne.s32.totalorder %s77_s11, 0 }
  0x1f   :  { %81 = shalt.err (%p103_p0)  }
  0x20   :  { %83 = vsyncmov [#allocation2 + $0x1] }
  0x23   :  { %s84_s0 = vpop.sfrf %83 }
  0x24   :  { %p104_p1 = scmp.ne.s32.totalorder %s84_s0, 0 }
  0x26   :  { %88 = shalt.err (%p104_p1)  }
  0x27   :  { %90 = vsyncmov [#allocation2 + $0x2] }
  0x2a   :  { %s91_s1 = vpop.sfrf %90 }
  0x2b   :  { %p105_p2 = scmp.ne.s32.totalorder %s91_s1, 0 }
  0x2d   :  { %95 = shalt.err (%p105_p2)  }
  0x2e   :  { %97 = vsyncmov [#allocation2 + $0x3] }
  0x31   :  { %s98_s6 = vpop.sfrf %97 }
  0x32   :  { %p106_p3 = scmp.ne.s32.totalorder %s98_s6, 0 }
  0x34   :  { %102 = shalt.err (%p106_p3)  }

</bundles_post_ra>
